<compile_context>
chip_gen: v7x
topology: tpu7x:2x2x1
jax: 0.10.0
libtpu: 0.0.40
codegen_flags: <defaults>
</compile_context>

<pallas_src>
import functools

import numpy as np

import jax
import jax.numpy as jnp
from jax.experimental import pallas as pl
from jax.experimental.pallas import tpu as pltpu


# ----------------------------------------------------------------------------
# Kernel 1: fused qkv + fc projection (two matmuls sharing one x tile)
# ----------------------------------------------------------------------------
def qkv_fc_kernel(x_ref, wq_ref, bq_ref, wc_ref, bc_ref, qkv_ref, cp_ref):
    # x: (TM, C); wq: (C, 3C); wc: (C, 9*hd)
    x = x_ref[...]
    qkv_ref[...] = (
        jnp.dot(x, wq_ref[...], preferred_element_type=jnp.float32) + bq_ref[...]
    )
    cp_ref[...] = (
        jnp.dot(x, wc_ref[...], preferred_element_type=jnp.float32) + bc_ref[...]
    )


def pallas_qkv_fc(x2d, wq, bq, wc, bc):
    M, K = x2d.shape
    Nq = wq.shape[1]
    Nc = wc.shape[1]
    # Tile M so production-sized inputs stay inside scoped VMEM (64 MiB on v7x).
    TM = M
    for cand in (2048, 1024, 512, 256, 128):
        if M % cand == 0:
            TM = cand
            break
    return pl.pallas_call(
        qkv_fc_kernel,
        out_shape=(
            jax.ShapeDtypeStruct((M, Nq), jnp.float32),
            jax.ShapeDtypeStruct((M, Nc), jnp.float32),
        ),
        grid=(M // TM,),
        in_specs=[
            pl.BlockSpec((TM, K), lambda i: (i, 0)),
            pl.BlockSpec((K, Nq), lambda i: (0, 0)),
            pl.BlockSpec((1, Nq), lambda i: (0, 0)),
            pl.BlockSpec((K, Nc), lambda i: (0, 0)),
            pl.BlockSpec((1, Nc), lambda i: (0, 0)),
        ],
        out_specs=(
            pl.BlockSpec((TM, Nq), lambda i: (i, 0)),
            pl.BlockSpec((TM, Nc), lambda i: (i, 0)),
        ),
        compiler_params=pltpu.CompilerParams(dimension_semantics=("parallel",)),
    )(x2d, wq, bq.reshape(1, Nq), wc, bc.reshape(1, Nc))


# ----------------------------------------------------------------------------
# Kernel 2: window attention (all windows at once) + fused output projection
# ----------------------------------------------------------------------------
def attn_proj_kernel(q_ref, k_ref, v_ref, bias_ref, wp_ref, bp_ref, o_ref, *, nh):
    # q,k,v: (B_, nh, N, hd) (q already scaled); bias: (nh, N, N)
    # wp: (nh, hd, C); bp: (1, C); o: (B_, N, C)
    B_, _, N, hd = q_ref.shape
    C = o_ref.shape[-1]
    acc = jnp.zeros((B_ * N, C), jnp.float32)
    for h in range(nh):                      # nh is small; unrolled
        qh = q_ref[:, h]                     # (B_, N, hd)
        kh = k_ref[:, h]
        vh = v_ref[:, h]
        s = jnp.einsum("bnd,bmd->bnm", qh, kh, preferred_element_type=jnp.float32)
        s = s + bias_ref[h][None]            # (N, N) broadcast over windows
        m = jnp.max(s, axis=-1, keepdims=True)
        prob = jnp.exp(s - m)
        prob = prob * pl.reciprocal(jnp.sum(prob, axis=-1, keepdims=True), approx=True)
        pv = jnp.einsum("bnm,bmd->bnd", prob, vh, preferred_element_type=jnp.float32)
        # fused proj: accumulate this head's (hd -> C) contribution
        acc = acc + jnp.dot(
            pv.reshape(B_ * N, hd), wp_ref[h], preferred_element_type=jnp.float32
        )
    o_ref[...] = (acc + bp_ref[...]).reshape(B_, N, C)


def pallas_attn_proj(q, k, v, bias, wp, bp):
    B_, nh, N, hd = q.shape
    C = wp.shape[-1]
    kern = functools.partial(attn_proj_kernel, nh=nh)
    return pl.pallas_call(
        kern,
        out_shape=jax.ShapeDtypeStruct((B_, N, C), jnp.float32),
        grid=(1,),
        in_specs=[
            pl.BlockSpec((B_, nh, N, hd), lambda i: (0, 0, 0, 0)),
            pl.BlockSpec((B_, nh, N, hd), lambda i: (0, 0, 0, 0)),
            pl.BlockSpec((B_, nh, N, hd), lambda i: (0, 0, 0, 0)),
            pl.BlockSpec((nh, N, N), lambda i: (0, 0, 0)),
            pl.BlockSpec((nh, hd, C), lambda i: (0, 0, 0)),
            pl.BlockSpec((1, C), lambda i: (0, 0)),
        ],
        out_specs=pl.BlockSpec((B_, N, C), lambda i: (0, 0, 0)),
        compiler_params=pltpu.CompilerParams(dimension_semantics=("arbitrary",)),
    )(q, k, v, bias, wp, bp)


# ----------------------------------------------------------------------------
# Kernel 3: grouped 3x3 dep_conv as 9 MXU matmuls + fused rate1/rate2 combine
# ----------------------------------------------------------------------------
def depconv_combine_kernel(cp_ref, w_ref, attn_ref, o_ref, *, H, W, r1, r2):
    # cp: (1, H+2, W+2, 9*hd) spatially pre-padded; w: (9, 9*hd, C) masked dense
    # attn: (1, H, W, C) window-attention branch output; o: (1, H, W, C)
    C = o_ref.shape[-1]
    KC = w_ref.shape[1]
    acc = jnp.zeros((H * W, C), jnp.float32)
    for dy in range(3):
        for dx in range(3):
            patch = cp_ref[0, dy:dy + H, dx:dx + W, :]           # (H, W, 9*hd)
            acc = acc + jnp.dot(
                patch.reshape(H * W, KC),
                w_ref[dy * 3 + dx],
                preferred_element_type=jnp.float32,
            )
    out = r1 * attn_ref[0].reshape(H * W, C) + r2 * acc
    o_ref[0] = out.reshape(H, W, C)


def pallas_depconv_combine(cp_pad, w_mat, attn, r1, r2):
    B, Hp, Wp, KC = cp_pad.shape
    H, W = Hp - 2, Wp - 2
    C = attn.shape[-1]
    kern = functools.partial(
        depconv_combine_kernel, H=H, W=W, r1=float(r1), r2=float(r2)
    )
    return pl.pallas_call(
        kern,
        out_shape=jax.ShapeDtypeStruct((B, H, W, C), jnp.float32),
        grid=(B,),
        in_specs=[
            pl.BlockSpec((1, Hp, Wp, KC), lambda b: (b, 0, 0, 0)),
            pl.BlockSpec((9, KC, C), lambda b: (0, 0, 0)),
            pl.BlockSpec((1, H, W, C), lambda b: (b, 0, 0, 0)),
        ],
        out_specs=pl.BlockSpec((1, H, W, C), lambda b: (b, 0, 0, 0)),
        compiler_params=pltpu.CompilerParams(dimension_semantics=("parallel",)),
    )(cp_pad, w_mat, attn)


# ----------------------------------------------------------------------------
# Full forward (Pallas kernels + JAX glue)
# ----------------------------------------------------------------------------
def acmix_forward(x, p, H, W, ws, nh):
    HIGH = jax.lax.Precision.HIGHEST
    B = x.shape[0]
    C = x.shape[-1]
    hd = C // nh
    N = ws * ws

    # ---- constant weight folding (would be precomputed once in a real module) ----
    # scale folded into the q slice of the qkv projection
    scale_vec = jnp.concatenate(
        [jnp.full((C,), p["scale"], jnp.float32), jnp.ones((2 * C,), jnp.float32)]
    )
    wq_s = p["w_qkv"] * scale_vec[None, :]
    bq_s = p["b_qkv"] * scale_vec
    # fc (1x1 conv over 3*nh channels) folded into the projection:
    #   conv_out[.., k*hd+d] = f_fc[.., k, .., d]
    w_qkv_r = p["w_qkv"].reshape(C, 3 * nh, hd)
    w_conv = jnp.einsum("kc,icd->ikd", p["w_fc"], w_qkv_r, precision=HIGH).reshape(
        C, 9 * hd
    )
    b_conv = (
        jnp.einsum("kc,cd->kd", p["w_fc"], p["b_qkv"].reshape(3 * nh, hd), precision=HIGH)
        + p["b_fc"][:, None]
    ).reshape(9 * hd)
    # grouped dep_conv weights as 9 dense (9*hd, C) matrices: nonzero only where the
    # input column's group (col % hd) matches the output channel's group (oc // nh).
    k_idx = jnp.arange(9 * hd) // hd
    g_idx = jnp.arange(9 * hd) % hd
    grp_mask = (g_idx[:, None] == (jnp.arange(C) // nh)[None, :]).astype(jnp.float32)
    w_sel = p["w_dep"][:, k_idx]                                   # (C, 9*hd, 3, 3)
    w_mat = (jnp.transpose(w_sel, (2, 3, 1, 0)) * grp_mask[None, None]).reshape(
        9, 9 * hd, C
    )

    # ---- kernel 1: fused qkv + fc projection ----
    qkv2d, cp2d = pallas_qkv_fc(x.reshape(B * H * W, C), wq_s, bq_s, w_conv, b_conv)
    qkv = qkv2d.reshape(B, H, W, 3 * C)
    cp = cp2d.reshape(B, H, W, 9 * hd)

    # ---- kernel 2: window attention + fused output projection ----
    win = (
        qkv.reshape(B, H // ws, ws, W // ws, ws, 3 * C)
        .transpose(0, 1, 3, 2, 4, 5)
        .reshape(-1, N, 3 * C)
    )
    B_ = win.shape[0]
    qkv5 = win.reshape(B_, N, 3, nh, hd).transpose(2, 0, 3, 1, 4)  # (3, B_, nh, N, hd)
    q, k, v = qkv5[0], qkv5[1], qkv5[2]
    wp = p["w_proj"].reshape(nh, hd, C)
    bp = p["b_proj"].reshape(1, C)
    attn_win = pallas_attn_proj(q, k, v, p["rpb"], wp, bp)         # (B_, N, C)
    # window_reverse
    attn = (
        attn_win.reshape(B, H // ws, W // ws, ws, ws, C)
        .transpose(0, 1, 3, 2, 4, 5)
        .reshape(B, H, W, C)
    )

    # ---- kernel 3: grouped 3x3 conv + rate1/rate2 combine ----
    # TODO(synk): the 1-pixel halo pad is done in JAX on the small 9*hd tensor; moving
    # it in-kernel (edge masking) would save one small HBM round trip.
    cp_pad = jnp.pad(cp, ((0, 0), (1, 1), (1, 1), (0, 0)))
    y = pallas_depconv_combine(cp_pad, w_mat, attn, p["rate1"], p["rate2"])
    # TODO(synk): attn_drop / proj_drop have p=0.0 (identity); the shifted-window mask
    # path (mask is not None) is not exercised here.
    return y


# ----------------------------------------------------------------------------
# Pure-JAX reference (mirrors the PyTorch forward) for verification
# ----------------------------------------------------------------------------
def reference_forward(x, p, H, W, ws, nh):
    HIGH = jax.lax.Precision.HIGHEST
    B = x.shape[0]
    C = x.shape[-1]
    hd = C // nh
    N = ws * ws

    qkv = jnp.einsum("bhwc,cd->bhwd", x, p["w_qkv"], precision=HIGH) + p["b_qkv"]

    # conv branch
    f_all = qkv.reshape(B, H * W, 3 * nh, hd).transpose(0, 2, 1, 3)
    f_fc = (
        jnp.einsum("oc,bcpd->bopd", p["w_fc"], f_all, precision=HIGH)
        + p["b_fc"][None, :, None, None]
    )
    f_conv = f_fc.transpose(0, 3, 1, 2).reshape(B, 9 * hd, H, W)
    out_conv = jax.lax.conv_general_dilated(
        f_conv,
        p["w_dep"],
        window_strides=(1, 1),
        padding=((1, 1), (1, 1)),
        dimension_numbers=("NCHW", "OIHW", "NCHW"),
        feature_group_count=hd,
        precision=HIGH,
    ).transpose(0, 2, 3, 1)

    # attention branch
    win = (
        qkv.reshape(B, H // ws, ws, W // ws, ws, 3 * C)
        .transpose(0, 1, 3, 2, 4, 5)
        .reshape(-1, N, 3 * C)
    )
    B_ = win.shape[0]
    qkv5 = win.reshape(B_, N, 3, nh, hd).transpose(2, 0, 3, 1, 4)
    q, k, v = qkv5[0] * p["scale"], qkv5[1], qkv5[2]
    attn = jnp.einsum("bhnd,bhmd->bhnm", q, k, precision=HIGH) + p["rpb"][None]
    attn = jax.nn.softmax(attn, axis=-1)
    xo = jnp.einsum("bhnm,bhmd->bhnd", attn, v, precision=HIGH)
    xo = xo.transpose(0, 2, 1, 3).reshape(B_, N, C)
    xo = jnp.einsum("bnc,cd->bnd", xo, p["w_proj"], precision=HIGH) + p["b_proj"]
    xo = (
        xo.reshape(B, H // ws, W // ws, ws, ws, C)
        .transpose(0, 1, 3, 2, 4, 5)
        .reshape(B, H, W, C)
    )
    return p["rate1"] * xo + p["rate2"] * out_conv


# ----------------------------------------------------------------------------
if __name__ == "__main__":
    B, H, W = 2, 16, 16
    dim, nh, ws = 32, 4, 8
    hd = dim // nh
    N = ws * ws

    key = jax.random.PRNGKey(0)
    ks = jax.random.split(key, 8)

    params = {
        "w_qkv": jax.random.normal(ks[0], (dim, 3 * dim), jnp.float32) * 0.05,
        "b_qkv": jax.random.normal(ks[1], (3 * dim,), jnp.float32) * 0.02,
        "w_proj": jax.random.normal(ks[2], (dim, dim), jnp.float32) * 0.05,
        "b_proj": jax.random.normal(ks[3], (dim,), jnp.float32) * 0.02,
        "w_fc": jax.random.normal(ks[4], (9, 3 * nh), jnp.float32) * 0.1,
        "b_fc": jax.random.normal(ks[5], (9,), jnp.float32) * 0.02,
        "rate1": 0.5,  # reset_parameters: ones() fills 0.5
        "rate2": 0.5,
        "scale": float(hd) ** -0.5,
    }

    # relative position bias (table init ~ trunc_normal(std=0.02))
    table = jax.random.normal(ks[6], ((2 * ws - 1) * (2 * ws - 1), nh), jnp.float32) * 0.02
    coords = jnp.stack(jnp.meshgrid(jnp.arange(ws), jnp.arange(ws), indexing="ij"))
    cf = coords.reshape(2, -1)
    rel = (cf[:, :, None] - cf[:, None, :]).transpose(1, 2, 0)
    idx = (rel[..., 0] + ws - 1) * (2 * ws - 1) + (rel[..., 1] + ws - 1)
    params["rpb"] = table[idx.reshape(-1)].reshape(N, N, nh).transpose(2, 0, 1)

    # dep_conv weight: identity-shift init from reset_parameters; bias becomes None
    k9 = (
        jnp.zeros((9, 3, 3), jnp.float32)
        .at[jnp.arange(9), jnp.arange(9) // 3, jnp.arange(9) % 3]
        .set(1.0)
    )
    params["w_dep"] = jnp.tile(k9[None], (dim, 1, 1, 1))  # (dim, 9, 3, 3)

    x = jax.random.normal(ks[7], (B, H, W, dim), jnp.float32)

    y = acmix_forward(x, params, H, W, ws, nh)
    y = jax.block_until_ready(y)

    y_ref = reference_forward(x, params, H, W, ws, nh)
    np.testing.assert_allclose(np.asarray(y), np.asarray(y_ref), rtol=1e-2, atol=1e-2)

    print("KERNEL_OK")
</pallas_src>

<mosaic_0001>
module attributes {stable_mosaic.version = 11 : i64} {
  func.func @qkv_fc_kernel(%arg0: i32, %arg1: memref<512x32xf32, #tpu.memory_space<vmem>>, %arg2: memref<32x96xf32, #tpu.memory_space<vmem>>, %arg3: memref<1x96xf32, #tpu.memory_space<vmem>>, %arg4: memref<32x72xf32, #tpu.memory_space<vmem>>, %arg5: memref<1x72xf32, #tpu.memory_space<vmem>>, %arg6: memref<512x96xf32, #tpu.memory_space<vmem>>, %arg7: memref<512x72xf32, #tpu.memory_space<vmem>>) attributes {dimension_semantics = [#tpu.dimension_semantics<parallel>], iteration_bounds = array<i64: 1>, scalar_prefetch = 0 : i64, scratch_operands = 0 : i64, tpu.core_type = #tpu.core_type<tc>, window_params = [{transform_indices = @transform_0, window_bounds = array<i64: 512, 32>}, {pipeline_mode = #tpu.pipeline_mode<synchronous>, transform_indices = @transform_1, window_bounds = array<i64: 32, 96>}, {pipeline_mode = #tpu.pipeline_mode<synchronous>, transform_indices = @transform_2, window_bounds = array<i64: 1, 96>}, {pipeline_mode = #tpu.pipeline_mode<synchronous>, transform_indices = @transform_3, window_bounds = array<i64: 32, 72>}, {pipeline_mode = #tpu.pipeline_mode<synchronous>, transform_indices = @transform_4, window_bounds = array<i64: 1, 72>}, {transform_indices = @transform_5, window_bounds = array<i64: 512, 96>}, {transform_indices = @transform_6, window_bounds = array<i64: 512, 72>}]} {
    %c0 = arith.constant 0 : index
    %c0_0 = arith.constant 0 : index
    %0 = vector.load %arg1[%c0, %c0_0] : memref<512x32xf32, #tpu.memory_space<vmem>>, vector<512x32xf32>
    %c0_1 = arith.constant 0 : index
    %c0_2 = arith.constant 0 : index
    %1 = vector.load %arg2[%c0_1, %c0_2] : memref<32x96xf32, #tpu.memory_space<vmem>>, vector<32x96xf32>
    %cst = arith.constant dense<0.000000e+00> : vector<512x96xf32>
    %2 = tpu.matmul %0, %1, %cst {dimension_numbers = #tpu.dot_dimension_numbers<[1], [0], [0], [1], [0, 0, 1, 1], [], []>} : vector<512x32xf32>, vector<32x96xf32>, vector<512x96xf32> -> vector<512x96xf32>
    %c0_3 = arith.constant 0 : index
    %c0_4 = arith.constant 0 : index
    %3 = vector.load %arg3[%c0_3, %c0_4] : memref<1x96xf32, #tpu.memory_space<vmem>>, vector<1x96xf32>
    %4 = vector.broadcast %3 : vector<1x96xf32> to vector<512x96xf32>
    %5 = arith.addf %2, %4 : vector<512x96xf32>
    %c0_5 = arith.constant 0 : index
    %c0_6 = arith.constant 0 : index
    %6 = vector.load %arg6[%c0_5, %c0_6] : memref<512x96xf32, #tpu.memory_space<vmem>>, vector<512x96xf32>
    tpu.vector_store %arg6[%c0_5, %c0_6], %5 {strides = array<i32>} : memref<512x96xf32, #tpu.memory_space<vmem>>, vector<512x96xf32>,
    %c0_7 = arith.constant 0 : index
    %c0_8 = arith.constant 0 : index
    %7 = vector.load %arg4[%c0_7, %c0_8] : memref<32x72xf32, #tpu.memory_space<vmem>>, vector<32x72xf32>
    %cst_9 = arith.constant dense<0.000000e+00> : vector<512x72xf32>
    %8 = tpu.matmul %0, %7, %cst_9 {dimension_numbers = #tpu.dot_dimension_numbers<[1], [0], [0], [1], [0, 0, 1, 1], [], []>} : vector<512x32xf32>, vector<32x72xf32>, vector<512x72xf32> -> vector<512x72xf32>
    %c0_10 = arith.constant 0 : index
    %c0_11 = arith.constant 0 : index
    %9 = vector.load %arg5[%c0_10, %c0_11] : memref<1x72xf32, #tpu.memory_space<vmem>>, vector<1x72xf32>
    %10 = vector.broadcast %9 : vector<1x72xf32> to vector<512x72xf32>
    %11 = arith.addf %8, %10 : vector<512x72xf32>
    %c0_12 = arith.constant 0 : index
    %c0_13 = arith.constant 0 : index
    %12 = vector.load %arg7[%c0_12, %c0_13] : memref<512x72xf32, #tpu.memory_space<vmem>>, vector<512x72xf32>
    tpu.vector_store %arg7[%c0_12, %c0_13], %11 {strides = array<i32>} : memref<512x72xf32, #tpu.memory_space<vmem>>, vector<512x72xf32>,
    return
  }
  func.func @transform_0(%arg0: i32) -> (i32, i32) {
    %c0_i32 = arith.constant 0 : i32
    %c0_i32_0 = arith.constant 0 : i32
    return %arg0, %c0_i32 : i32, i32
  }
  func.func @transform_1(%arg0: i32) -> (i32, i32) {
    %c0_i32 = arith.constant 0 : i32
    %c0_i32_0 = arith.constant 0 : i32
    %c0_i32_1 = arith.constant 0 : i32
    return %c0_i32, %c0_i32_0 : i32, i32
  }
  func.func @transform_2(%arg0: i32) -> (i32, i32) {
    %c0_i32 = arith.constant 0 : i32
    %c0_i32_0 = arith.constant 0 : i32
    %c0_i32_1 = arith.constant 0 : i32
    return %c0_i32, %c0_i32_0 : i32, i32
  }
  func.func @transform_3(%arg0: i32) -> (i32, i32) {
    %c0_i32 = arith.constant 0 : i32
    %c0_i32_0 = arith.constant 0 : i32
    %c0_i32_1 = arith.constant 0 : i32
    return %c0_i32, %c0_i32_0 : i32, i32
  }
  func.func @transform_4(%arg0: i32) -> (i32, i32) {
    %c0_i32 = arith.constant 0 : i32
    %c0_i32_0 = arith.constant 0 : i32
    %c0_i32_1 = arith.constant 0 : i32
    return %c0_i32, %c0_i32_0 : i32, i32
  }
  func.func @transform_5(%arg0: i32) -> (i32, i32) {
    %c0_i32 = arith.constant 0 : i32
    %c0_i32_0 = arith.constant 0 : i32
    return %arg0, %c0_i32 : i32, i32
  }
  func.func @transform_6(%arg0: i32) -> (i32, i32) {
    %c0_i32 = arith.constant 0 : i32
    %c0_i32_0 = arith.constant 0 : i32
    return %arg0, %c0_i32 : i32, i32
  }
}

</mosaic_0001>

<bundles_post_ra>
// kernel: tpu_custom_call.1
= control target key start
LH: loop header
LB: loop body
LE: loop exit
PB: predicated region body
PF: predicated region fallthrough
CT: control target
= control target key end

     0   :  { %vm97_vm0 = vcmask 261120   ;;  %vm675_vm1 = vcmask 785408   ;;  %vm1136_vm2 = vcmask 588800   ;;  %s2728_s1 = inlined_call_operand.vmem [shape: f32[32,96], index: 1, kind: input, shape index: {}]   ;;  %s2729_s3 = inlined_call_operand.vmem [shape: f32[32,72], index: 3, kind: input, shape index: {}]   ;;  %s2730_s0 = inlined_call_operand.vmem [shape: f32[512,32], index: 0, kind: input, shape index: {}]   ;;  %s2731_s2 = inlined_call_operand.vmem [shape: f32[1,96], index: 2, kind: input, shape index: {}]   ;;  %s2732_s4 = inlined_call_operand.vmem [shape: f32[1,72], index: 4, kind: input, shape index: {}]   ;;  %s2733_s5 = inlined_call_operand.vmem [shape: f32[512,96], index: 5, kind: output, shape index: {0}]   ;;  %s2734_s6 = inlined_call_operand.vmem [shape: f32[512,72], index: 6, kind: output, shape index: {1}]  }
   0x1   :  { %v86_v0 = vld [vmem:[%s2728_s1] sm:$0xff]  ;;  %v87_v1 = vld [vmem:[%s2728_s1 + $0x8] sm:$0xff]  ;;  %v88_v5 = vld [vmem:[%s2728_s1 + $0x10] sm:$0xff] }
   0x2   :  { %v740_v2 = vld [vmem:[%s2729_s3] sm:$0xff]  ;;  %v1683_v3 = vpack.c.bf16 %v87_v1, %v86_v0  ;;  %v741_v4 = vld [vmem:[%s2729_s3 + $0x8] sm:$0xff]  ;;  %v89_v6 = vld [vmem:[%s2728_s1 + $0x18] sm:$0xff] }
   0x3   :  { %v1691_v7 = vpack.c.bf16 %v741_v4, %v740_v2  ;;  %v1687_v8 = vpack.c.bf16 %v89_v6, %v88_v5  ;;  %v742_v9 = vld [vmem:[%s2729_s3 + $0x10] sm:$0xff]  ;;  %v743_v10 = vld [vmem:[%s2729_s3 + $0x18] sm:$0xff]  ;;  %v22_v11 = vld [vmem:[%s2730_s0] sm:$0xff] }
   0x4   :  { %1684 = vmatprep.subr.bf16.mxu0 %v1683_v3  ;;  %v1695_v12 = vpack.c.bf16 %v743_v10, %v742_v9  ;;  %1483 = vmatprep.mubr.msk.f32.mxu0 %vm97_vm0, %v22_v11  ;;  %v23_v13 = vld [vmem:[%s2730_s0 + $0x8] sm:$0xff]  ;;  %v24_v14 = vld [vmem:[%s2730_s0 + $0x10] sm:$0xff]  ;;  %v25_v15 = vld [vmem:[%s2730_s0 + $0x18] sm:$0xff] }
   0x5   :  { %1692 = vmatprep.subr.bf16.mxu1 %v1691_v7  ;;  %1686 = vmatpush3.bf16.msra.mxu0 %v1683_v3  ;;  %v26_v16 = vld [vmem:[%s2730_s0 + $0x20] sm:$0xff]  ;;  %v27_v17 = vld [vmem:[%s2730_s0 + $0x28] sm:$0xff]  ;;  %v28_v18 = vld [vmem:[%s2730_s0 + $0x30] sm:$0xff] }
   0x6   :  { %1694 = vmatpush3.bf16.msra.mxu1 %v1691_v7  ;;  %1688 = vmatprep.subr.bf16.mxu0 %v1687_v8  ;;  %v29_v19 = vld [vmem:[%s2730_s0 + $0x38] sm:$0xff]  ;;  %v30_v20 = vld [vmem:[%s2730_s0 + $0x40] sm:$0xff]  ;;  %v31_v21 = vld [vmem:[%s2730_s0 + $0x48] sm:$0xff] }
   0x7   :  { %1696 = vmatprep.subr.bf16.mxu1 %v1695_v12  ;;  %1587 = vmatprep.mubr.msk.f32.mxu1 %vm97_vm0, %v22_v11  ;;  %v32_v22 = vld [vmem:[%s2730_s0 + $0x50] sm:$0xff]  ;;  %v33_v23 = vld [vmem:[%s2730_s0 + $0x58] sm:$0xff]  ;;  %v34_v24 = vld [vmem:[%s2730_s0 + $0x60] sm:$0xff] }
   0x8   :  { %v35_v25 = vld [vmem:[%s2730_s0 + $0x68] sm:$0xff]  ;;  %v36_v26 = vld [vmem:[%s2730_s0 + $0x70] sm:$0xff]  ;;  %v37_v27 = vld [vmem:[%s2730_s0 + $0x78] sm:$0xff] }
   0x9   :  { %1690 = vmatpush3.bf16.msra.mxu0 %v1687_v8  ;;  %v38_v28 = vld [vmem:[%s2730_s0 + $0x80] sm:$0xff]  ;;  %v39_v29 = vld [vmem:[%s2730_s0 + $0x88] sm:$0xff]  ;;  %v40_v30 = vld [vmem:[%s2730_s0 + $0x90] sm:$0xff] }
   0xa   :  { %1698 = vmatpush3.bf16.msra.mxu1 %v1695_v12  ;;  %v41_v31 = vld [vmem:[%s2730_s0 + $0x98] sm:$0xff]  ;;  %v42_v32 = vld [vmem:[%s2730_s0 + $0xa0] sm:$0xff]  ;;  %v43_v33 = vld [vmem:[%s2730_s0 + $0xa8] sm:$0xff] }
   0xb   :  { %v44_v34 = vld [vmem:[%s2730_s0 + $0xb0] sm:$0xff]  ;;  %v45_v35 = vld [vmem:[%s2730_s0 + $0xb8] sm:$0xff]  ;;  %v46_v36 = vld [vmem:[%s2730_s0 + $0xc0] sm:$0xff] }
   0xc   :  { %1484 = vmatmul.mubr.msk.f32.vlgmr.msra.gmra.mrb[0].mxu0 %vm97_vm0, %v23_v13  ;;  %v47_v37 = vld [vmem:[%s2730_s0 + $0xc8] sm:$0xff]  ;;  %v48_v38 = vld [vmem:[%s2730_s0 + $0xd0] sm:$0xff]  ;;  %v49_v39 = vld [vmem:[%s2730_s0 + $0xd8] sm:$0xff] }
   0xd   :  { %1588 = vmatmul.mubr.msk.f32.vlgmr.msra.gmra.mrb[0].mxu1 %vm97_vm0, %v23_v13  ;;  %1486 = vmatprep.mubr.msk.f32.mxu0 %vm97_vm0, %v24_v14  ;;  %v50_v40 = vld [vmem:[%s2730_s0 + $0xe0] sm:$0xff]  ;;  %v51_v41 = vld [vmem:[%s2730_s0 + $0xe8] sm:$0xff]  ;;  %v52_v42 = vld [vmem:[%s2730_s0 + $0xf0] sm:$0xff] }
   0xe   :  { %1590 = vmatprep.mubr.msk.f32.mxu1 %vm97_vm0, %v24_v14  ;;  %v53_v43 = vld [vmem:[%s2730_s0 + $0xf8] sm:$0xff]  ;;  %v54_v44 = vld [vmem:[%s2730_s0 + $0x100] sm:$0xff]  ;;  %v55_v45 = vld [vmem:[%s2730_s0 + $0x108] sm:$0xff] }
   0xf   :  { %v56_v46 = vld [vmem:[%s2730_s0 + $0x110] sm:$0xff]  ;;  %v57_v47 = vld [vmem:[%s2730_s0 + $0x118] sm:$0xff]  ;;  %v58_v48 = vld [vmem:[%s2730_s0 + $0x120] sm:$0xff] }
  0x10   :  { %1487 = vmatmul.mubr.msk.f32.gmra.mrb[2].mxu0 %vm97_vm0, %v25_v15  ;;  %v59_v49 = vld [vmem:[%s2730_s0 + $0x128] sm:$0xff]  ;;  %v60_v50 = vld [vmem:[%s2730_s0 + $0x130] sm:$0xff]  ;;  %v61_v51 = vld [vmem:[%s2730_s0 + $0x138] sm:$0xff] }
  0x11   :  { %1591 = vmatmul.mubr.msk.f32.gmra.mrb[2].mxu1 %vm97_vm0, %v25_v15  ;;  %1489 = vmatprep.mubr.msk.f32.mxu0 %vm97_vm0, %v26_v16  ;;  %v62_v52 = vld [vmem:[%s2730_s0 + $0x140] sm:$0xff]  ;;  %v63_v53 = vld [vmem:[%s2730_s0 + $0x148] sm:$0xff]  ;;  %v64_v54 = vld [vmem:[%s2730_s0 + $0x150] sm:$0xff] }
  0x12   :  { %1593 = vmatprep.mubr.msk.f32.mxu1 %vm97_vm0, %v26_v16  ;;  %v65_v55 = vld [vmem:[%s2730_s0 + $0x158] sm:$0xff]  ;;  %v66_v56 = vld [vmem:[%s2730_s0 + $0x160] sm:$0xff]  ;;  %v67_v57 = vld [vmem:[%s2730_s0 + $0x168] sm:$0xff] }
  0x13   :  { %v68_v58 = vld [vmem:[%s2730_s0 + $0x170] sm:$0xff]  ;;  %v69_v59 = vld [vmem:[%s2730_s0 + $0x178] sm:$0xff]  ;;  %v70_v60 = vld [vmem:[%s2730_s0 + $0x180] sm:$0xff] }
  0x14   :  { %1490 = vmatmul.mubr.msk.f32.gmra.mrb[4].mxu0 %vm97_vm0, %v27_v17  ;;  %v71_v61 = vld [vmem:[%s2730_s0 + $0x188] sm:$0xff]  ;;  %v72_v62 = vld [vmem:[%s2730_s0 + $0x190] sm:$0xff]  ;;  %v73_v63 = vld [vmem:[%s2730_s0 + $0x198] sm:$0xff] }
  0x15   :  { %1594 = vmatmul.mubr.msk.f32.gmra.mrb[4].mxu1 %vm97_vm0, %v27_v17  ;;  %1492 = vmatprep.mubr.msk.f32.mxu0 %vm97_vm0, %v28_v18  ;;  %v74_v0 = vld [vmem:[%s2730_s0 + $0x1a0] sm:$0xff]  ;;  %v75_v1 = vld [vmem:[%s2730_s0 + $0x1a8] sm:$0xff]  ;;  %v76_v2 = vld [vmem:[%s2730_s0 + $0x1b0] sm:$0xff] }
  0x16   :  { %1596 = vmatprep.mubr.msk.f32.mxu1 %vm97_vm0, %v28_v18  ;;  %v77_v3 = vld [vmem:[%s2730_s0 + $0x1b8] sm:$0xff]  ;;  %v78_v4 = vld [vmem:[%s2730_s0 + $0x1c0] sm:$0xff]  ;;  %v79_v5 = vld [vmem:[%s2730_s0 + $0x1c8] sm:$0xff] }
  0x17   :  { %v80_v6 = vld [vmem:[%s2730_s0 + $0x1d0] sm:$0xff]  ;;  %v81_v7 = vld [vmem:[%s2730_s0 + $0x1d8] sm:$0xff]  ;;  %v82_v8 = vld [vmem:[%s2730_s0 + $0x1e0] sm:$0xff] }
  0x18   :  { %1493 = vmatmul.mubr.msk.f32.gmra.mrb[6].mxu0 %vm97_vm0, %v29_v19  ;;  %v83_v9 = vld [vmem:[%s2730_s0 + $0x1e8] sm:$0xff]  ;;  %v84_v10 = vld [vmem:[%s2730_s0 + $0x1f0] sm:$0xff]  ;;  %v85_v11 = vld [vmem:[%s2730_s0 + $0x1f8] sm:$0xff] }
  0x19   :  { %1597 = vmatmul.mubr.msk.f32.gmra.mrb[6].mxu1 %vm97_vm0, %v29_v19  ;;  %1495 = vmatprep.mubr.msk.f32.mxu0 %vm97_vm0, %v30_v20  ;;  %v2081_v12 = vld [vmem:[%s2731_s2] ss:$0 sm:$0xff] }
  0x1a   :  { %1599 = vmatprep.mubr.msk.f32.mxu1 %vm97_vm0, %v30_v20  ;;  %v2086_v13 = vld [vmem:[%s2732_s4] ss:$0 sm:$0xff] }
  0x1c   :  { %1496 = vmatmul.mubr.msk.f32.gmra.mrb[8].mxu0 %vm97_vm0, %v31_v21 }
  0x1d   :  { %1600 = vmatmul.mubr.msk.f32.gmra.mrb[8].mxu1 %vm97_vm0, %v31_v21  ;;  %1498 = vmatprep.mubr.msk.f32.mxu0 %vm97_vm0, %v32_v22 }
  0x1e   :  { %1602 = vmatprep.mubr.msk.f32.mxu1 %vm97_vm0, %v32_v22 }
  0x20   :  { %1499 = vmatmul.mubr.msk.f32.gmra.mrb[10].mxu0 %vm97_vm0, %v33_v23 }
  0x21   :  { %1603 = vmatmul.mubr.msk.f32.gmra.mrb[10].mxu1 %vm97_vm0, %v33_v23  ;;  %1501 = vmatprep.mubr.msk.f32.mxu0 %vm97_vm0, %v34_v24 }
  0x22   :  { %1605 = vmatprep.mubr.msk.f32.mxu1 %vm97_vm0, %v34_v24 }
  0x24   :  { %1502 = vmatmul.mubr.msk.f32.gmra.mrb[12].mxu0 %vm97_vm0, %v35_v25 }
  0x25   :  { %1606 = vmatmul.mubr.msk.f32.gmra.mrb[12].mxu1 %vm97_vm0, %v35_v25  ;;  %1504 = vmatprep.mubr.msk.f32.mxu0 %vm97_vm0, %v36_v26 }
  0x26   :  { %1608 = vmatprep.mubr.msk.f32.mxu1 %vm97_vm0, %v36_v26 }
  0x28   :  { %1505 = vmatmul.mubr.msk.f32.gmra.mrb[14].mxu0 %vm97_vm0, %v37_v27 }
  0x29   :  { %1609 = vmatmul.mubr.msk.f32.gmra.mrb[14].mxu1 %vm97_vm0, %v37_v27  ;;  %1507 = vmatprep.mubr.msk.f32.mxu0 %vm97_vm0, %v38_v28 }
  0x2a   :  { %1611 = vmatprep.mubr.msk.f32.mxu1 %vm97_vm0, %v38_v28 }
  0x2c   :  { %1508 = vmatmul.mubr.msk.f32.gmra.mrb[16].mxu0 %vm97_vm0, %v39_v29 }
  0x2d   :  { %1612 = vmatmul.mubr.msk.f32.gmra.mrb[16].mxu1 %vm97_vm0, %v39_v29  ;;  %1510 = vmatprep.mubr.msk.f32.mxu0 %vm97_vm0, %v40_v30 }
  0x2e   :  { %1614 = vmatprep.mubr.msk.f32.mxu1 %vm97_vm0, %v40_v30 }
  0x30   :  { %1511 = vmatmul.mubr.msk.f32.gmra.mrb[18].mxu0 %vm97_vm0, %v41_v31 }
  0x31   :  { %1615 = vmatmul.mubr.msk.f32.gmra.mrb[18].mxu1 %vm97_vm0, %v41_v31  ;;  %1513 = vmatprep.mubr.msk.f32.mxu0 %vm97_vm0, %v42_v32 }
  0x32   :  { %1617 = vmatprep.mubr.msk.f32.mxu1 %vm97_vm0, %v42_v32 }
  0x34   :  { %1514 = vmatmul.mubr.msk.f32.gmra.mrb[20].mxu0 %vm97_vm0, %v43_v33 }
  0x35   :  { %1618 = vmatmul.mubr.msk.f32.gmra.mrb[20].mxu1 %vm97_vm0, %v43_v33  ;;  %1516 = vmatprep.mubr.msk.f32.mxu0 %vm97_vm0, %v44_v34 }
  0x36   :  { %1620 = vmatprep.mubr.msk.f32.mxu1 %vm97_vm0, %v44_v34 }
  0x38   :  { %1517 = vmatmul.mubr.msk.f32.gmra.mrb[22].mxu0 %vm97_vm0, %v45_v35 }
  0x39   :  { %1621 = vmatmul.mubr.msk.f32.gmra.mrb[22].mxu1 %vm97_vm0, %v45_v35  ;;  %1519 = vmatprep.mubr.msk.f32.mxu0 %vm97_vm0, %v46_v36 }
  0x3a   :  { %1623 = vmatprep.mubr.msk.f32.mxu1 %vm97_vm0, %v46_v36 }
  0x3c   :  { %1520 = vmatmul.mubr.msk.f32.gmra.mrb[24].mxu0 %vm97_vm0, %v47_v37 }
  0x3d   :  { %1624 = vmatmul.mubr.msk.f32.gmra.mrb[24].mxu1 %vm97_vm0, %v47_v37  ;;  %1522 = vmatprep.mubr.msk.f32.mxu0 %vm97_vm0, %v48_v38 }
  0x3e   :  { %1626 = vmatprep.mubr.msk.f32.mxu1 %vm97_vm0, %v48_v38 }
  0x40   :  { %1523 = vmatmul.mubr.msk.f32.gmra.mrb[26].mxu0 %vm97_vm0, %v49_v39 }
  0x41   :  { %1627 = vmatmul.mubr.msk.f32.gmra.mrb[26].mxu1 %vm97_vm0, %v49_v39  ;;  %1525 = vmatprep.mubr.msk.f32.mxu0 %vm97_vm0, %v50_v40 }
  0x42   :  { %1629 = vmatprep.mubr.msk.f32.mxu1 %vm97_vm0, %v50_v40 }
  0x44   :  { %1526 = vmatmul.mubr.msk.f32.gmra.mrb[28].mxu0 %vm97_vm0, %v51_v41 }
  0x45   :  { %1630 = vmatmul.mubr.msk.f32.gmra.mrb[28].mxu1 %vm97_vm0, %v51_v41  ;;  %1528 = vmatprep.mubr.msk.f32.mxu0 %vm97_vm0, %v52_v42 }
  0x46   :  { %1632 = vmatprep.mubr.msk.f32.mxu1 %vm97_vm0, %v52_v42 }
  0x48   :  { %1529 = vmatmul.mubr.msk.f32.gmra.mrb[30].mxu0 %vm97_vm0, %v53_v43 }
  0x49   :  { %1633 = vmatmul.mubr.msk.f32.gmra.mrb[30].mxu1 %vm97_vm0, %v53_v43  ;;  %1531 = vmatprep.mubr.msk.f32.mxu0 %vm97_vm0, %v54_v44 }
  0x4a   :  { %1635 = vmatprep.mubr.msk.f32.mxu1 %vm97_vm0, %v54_v44 }
  0x4c   :  { %1532 = vmatmul.mubr.msk.f32.gmra.mrb[32].mxu0 %vm97_vm0, %v55_v45 }
  0x4d   :  { %1636 = vmatmul.mubr.msk.f32.gmra.mrb[32].mxu1 %vm97_vm0, %v55_v45  ;;  %1534 = vmatprep.mubr.msk.f32.mxu0 %vm97_vm0, %v56_v46 }
  0x4e   :  { %1638 = vmatprep.mubr.msk.f32.mxu1 %vm97_vm0, %v56_v46 }
  0x50   :  { %1535 = vmatmul.mubr.msk.f32.gmra.mrb[34].mxu0 %vm97_vm0, %v57_v47 }
  0x51   :  { %1639 = vmatmul.mubr.msk.f32.gmra.mrb[34].mxu1 %vm97_vm0, %v57_v47  ;;  %1537 = vmatprep.mubr.msk.f32.mxu0 %vm97_vm0, %v58_v48 }
  0x52   :  { %1641 = vmatprep.mubr.msk.f32.mxu1 %vm97_vm0, %v58_v48 }
  0x54   :  { %1538 = vmatmul.mubr.msk.f32.gmra.mrb[36].mxu0 %vm97_vm0, %v59_v49 }
  0x55   :  { %1642 = vmatmul.mubr.msk.f32.gmra.mrb[36].mxu1 %vm97_vm0, %v59_v49  ;;  %1540 = vmatprep.mubr.msk.f32.mxu0 %vm97_vm0, %v60_v50 }
  0x56   :  { %1644 = vmatprep.mubr.msk.f32.mxu1 %vm97_vm0, %v60_v50 }
  0x58   :  { %1541 = vmatmul.mubr.msk.f32.gmra.mrb[38].mxu0 %vm97_vm0, %v61_v51 }
  0x59   :  { %1645 = vmatmul.mubr.msk.f32.gmra.mrb[38].mxu1 %vm97_vm0, %v61_v51  ;;  %1543 = vmatprep.mubr.msk.f32.mxu0 %vm97_vm0, %v62_v52 }
  0x5a   :  { %1647 = vmatprep.mubr.msk.f32.mxu1 %vm97_vm0, %v62_v52 }
  0x5c   :  { %1544 = vmatmul.mubr.msk.f32.gmra.mrb[40].mxu0 %vm97_vm0, %v63_v53 }
  0x5d   :  { %1648 = vmatmul.mubr.msk.f32.gmra.mrb[40].mxu1 %vm97_vm0, %v63_v53  ;;  %1546 = vmatprep.mubr.msk.f32.mxu0 %vm97_vm0, %v64_v54 }
  0x5e   :  { %1650 = vmatprep.mubr.msk.f32.mxu1 %vm97_vm0, %v64_v54 }
  0x60   :  { %1547 = vmatmul.mubr.msk.f32.gmra.mrb[42].mxu0 %vm97_vm0, %v65_v55 }
  0x61   :  { %1651 = vmatmul.mubr.msk.f32.gmra.mrb[42].mxu1 %vm97_vm0, %v65_v55  ;;  %1549 = vmatprep.mubr.msk.f32.mxu0 %vm97_vm0, %v66_v56 }
  0x62   :  { %1653 = vmatprep.mubr.msk.f32.mxu1 %vm97_vm0, %v66_v56 }
  0x64   :  { %1550 = vmatmul.mubr.msk.f32.gmra.mrb[44].mxu0 %vm97_vm0, %v67_v57 }
  0x65   :  { %1654 = vmatmul.mubr.msk.f32.gmra.mrb[44].mxu1 %vm97_vm0, %v67_v57  ;;  %1552 = vmatprep.mubr.msk.f32.mxu0 %vm97_vm0, %v68_v58 }
  0x66   :  { %1656 = vmatprep.mubr.msk.f32.mxu1 %vm97_vm0, %v68_v58 }
  0x68   :  { %1553 = vmatmul.mubr.msk.f32.gmra.mrb[46].mxu0 %vm97_vm0, %v69_v59 }
  0x69   :  { %1657 = vmatmul.mubr.msk.f32.gmra.mrb[46].mxu1 %vm97_vm0, %v69_v59  ;;  %1555 = vmatprep.mubr.msk.f32.mxu0 %vm97_vm0, %v70_v60 }
  0x6a   :  { %1659 = vmatprep.mubr.msk.f32.mxu1 %vm97_vm0, %v70_v60 }
  0x6c   :  { %1556 = vmatmul.mubr.msk.f32.gmra.mrb[48].mxu0 %vm97_vm0, %v71_v61 }
  0x6d   :  { %1660 = vmatmul.mubr.msk.f32.gmra.mrb[48].mxu1 %vm97_vm0, %v71_v61  ;;  %1558 = vmatprep.mubr.msk.f32.mxu0 %vm97_vm0, %v72_v62 }
  0x6e   :  { %1662 = vmatprep.mubr.msk.f32.mxu1 %vm97_vm0, %v72_v62 }
  0x70   :  { %1559 = vmatmul.mubr.msk.f32.gmra.mrb[50].mxu0 %vm97_vm0, %v73_v63 }
  0x71   :  { %1663 = vmatmul.mubr.msk.f32.gmra.mrb[50].mxu1 %vm97_vm0, %v73_v63  ;;  %1561 = vmatprep.mubr.msk.f32.mxu0 %vm97_vm0, %v74_v0 }
  0x72   :  { %1665 = vmatprep.mubr.msk.f32.mxu1 %vm97_vm0, %v74_v0 }
  0x74   :  { %1562 = vmatmul.mubr.msk.f32.gmra.mrb[52].mxu0 %vm97_vm0, %v75_v1 }
  0x75   :  { %1666 = vmatmul.mubr.msk.f32.gmra.mrb[52].mxu1 %vm97_vm0, %v75_v1  ;;  %1564 = vmatprep.mubr.msk.f32.mxu0 %vm97_vm0, %v76_v2 }
  0x76   :  { %1668 = vmatprep.mubr.msk.f32.mxu1 %vm97_vm0, %v76_v2 }
  0x78   :  { %1565 = vmatmul.mubr.msk.f32.gmra.mrb[54].mxu0 %vm97_vm0, %v77_v3 }
  0x79   :  { %1669 = vmatmul.mubr.msk.f32.gmra.mrb[54].mxu1 %vm97_vm0, %v77_v3  ;;  %1567 = vmatprep.mubr.msk.f32.mxu0 %vm97_vm0, %v78_v4 }
  0x7a   :  { %1671 = vmatprep.mubr.msk.f32.mxu1 %vm97_vm0, %v78_v4 }
  0x7c   :  { %1568 = vmatmul.mubr.msk.f32.gmra.mrb[56].mxu0 %vm97_vm0, %v79_v5 }
  0x7d   :  { %1672 = vmatmul.mubr.msk.f32.gmra.mrb[56].mxu1 %vm97_vm0, %v79_v5  ;;  %1570 = vmatprep.mubr.msk.f32.mxu0 %vm97_vm0, %v80_v6 }
  0x7e   :  { %1674 = vmatprep.mubr.msk.f32.mxu1 %vm97_vm0, %v80_v6 }
  0x80   :  { %1571 = vmatmul.mubr.msk.f32.gmra.mrb[58].mxu0 %vm97_vm0, %v81_v7 }
  0x81   :  { %1675 = vmatmul.mubr.msk.f32.gmra.mrb[58].mxu1 %vm97_vm0, %v81_v7  ;;  %1573 = vmatprep.mubr.msk.f32.mxu0 %vm97_vm0, %v82_v8 }
  0x82   :  { %1677 = vmatprep.mubr.msk.f32.mxu1 %vm97_vm0, %v82_v8 }
  0x84   :  { %1574 = vmatmul.mubr.msk.f32.gmra.mrb[60].mxu0 %vm97_vm0, %v83_v9 }
  0x85   :  { %1678 = vmatmul.mubr.msk.f32.gmra.mrb[60].mxu1 %vm97_vm0, %v83_v9  ;;  %1576 = vmatprep.mubr.msk.f32.mxu0 %vm97_vm0, %v84_v10 }
  0x86   :  { %1680 = vmatprep.mubr.msk.f32.mxu1 %vm97_vm0, %v84_v10 }
  0x88   :  { %1577 = vmatmul.mubr.msk.f32.gmra.mrb[62].mxu0 %vm97_vm0, %v85_v11 }
  0x89   :  { %1681 = vmatmul.mubr.msk.f32.gmra.mrb[62].mxu1 %vm97_vm0, %v85_v11 }
  0xdf   :  { %v1485_v14 = vpop.f32.mrb[0].mxu0 }
  0xe0   :  { %v362_v15 = vadd.f32 %v1485_v14, %v2081_v12  ;;  %v1589_v16 = vpop.f32.mrb[0].mxu1  ;;  %v356_v17 = vpop.f32.mrb[1].mxu0 }
  0xe1   :  { %v823_v18 = vadd.f32 %v1589_v16, %v2086_v13  ;;  %v357_v19 = vadd.f32 %v2081_v12, %v356_v17  ;;  %v817_v20 = vpop.f32.mrb[1].mxu1 }
  0xe2   :  { %677 = vst.msk [vmem:[%s2733_s5 + $0x8] sm:$0xff] %vm675_vm1, %v362_v15  ;;  %v818_v21 = vadd.f32 %v2086_v13, %v817_v20 }
  0xe3   :  { %1138 = vst.msk [vmem:[%s2734_s6 + $0x8] sm:$0xff] %vm1136_vm2, %v823_v18  ;;  %v1488_v22 = vpop.f32.mrb[2].mxu0 }
  0xe4   :  { %676 = vst.msk [vmem:[%s2733_s5] sm:$0xff] %vm675_vm1, %v357_v19  ;;  %v372_v23 = vadd.f32 %v1488_v22, %v2081_v12  ;;  %v1592_v24 = vpop.f32.mrb[2].mxu1  ;;  %v366_v25 = vpop.f32.mrb[3].mxu0 }
  0xe5   :  { %1137 = vst.msk [vmem:[%s2734_s6] sm:$0xff] %vm1136_vm2, %v818_v21  ;;  %v833_v26 = vadd.f32 %v1592_v24, %v2086_v13  ;;  %v367_v27 = vadd.f32 %v2081_v12, %v366_v25  ;;  %v827_v28 = vpop.f32.mrb[3].mxu1 }
  0xe6   :  { %679 = vst.msk [vmem:[%s2733_s5 + $0x18] sm:$0xff] %vm675_vm1, %v372_v23  ;;  %v828_v29 = vadd.f32 %v2086_v13, %v827_v28 }
  0xe7   :  { %1140 = vst.msk [vmem:[%s2734_s6 + $0x18] sm:$0xff] %vm1136_vm2, %v833_v26  ;;  %v1491_v30 = vpop.f32.mrb[4].mxu0 }
  0xe8   :  { %678 = vst.msk [vmem:[%s2733_s5 + $0x10] sm:$0xff] %vm675_vm1, %v367_v27  ;;  %v382_v31 = vadd.f32 %v1491_v30, %v2081_v12  ;;  %v1595_v32 = vpop.f32.mrb[4].mxu1  ;;  %v376_v33 = vpop.f32.mrb[5].mxu0 }
  0xe9   :  { %1139 = vst.msk [vmem:[%s2734_s6 + $0x10] sm:$0xff] %vm1136_vm2, %v828_v29  ;;  %v843_v34 = vadd.f32 %v1595_v32, %v2086_v13  ;;  %v377_v35 = vadd.f32 %v2081_v12, %v376_v33  ;;  %v837_v36 = vpop.f32.mrb[5].mxu1 }
  0xea   :  { %681 = vst.msk [vmem:[%s2733_s5 + $0x28] sm:$0xff] %vm675_vm1, %v382_v31  ;;  %v838_v37 = vadd.f32 %v2086_v13, %v837_v36 }
  0xeb   :  { %1142 = vst.msk [vmem:[%s2734_s6 + $0x28] sm:$0xff] %vm1136_vm2, %v843_v34  ;;  %v1494_v38 = vpop.f32.mrb[6].mxu0 }
  0xec   :  { %680 = vst.msk [vmem:[%s2733_s5 + $0x20] sm:$0xff] %vm675_vm1, %v377_v35  ;;  %v392_v39 = vadd.f32 %v1494_v38, %v2081_v12  ;;  %v1598_v40 = vpop.f32.mrb[6].mxu1  ;;  %v386_v41 = vpop.f32.mrb[7].mxu0 }
  0xed   :  { %1141 = vst.msk [vmem:[%s2734_s6 + $0x20] sm:$0xff] %vm1136_vm2, %v838_v37  ;;  %v853_v42 = vadd.f32 %v1598_v40, %v2086_v13  ;;  %v387_v43 = vadd.f32 %v2081_v12, %v386_v41  ;;  %v847_v44 = vpop.f32.mrb[7].mxu1 }
  0xee   :  { %683 = vst.msk [vmem:[%s2733_s5 + $0x38] sm:$0xff] %vm675_vm1, %v392_v39  ;;  %v848_v45 = vadd.f32 %v2086_v13, %v847_v44 }
  0xef   :  { %1144 = vst.msk [vmem:[%s2734_s6 + $0x38] sm:$0xff] %vm1136_vm2, %v853_v42  ;;  %v1497_v46 = vpop.f32.mrb[8].mxu0 }
  0xf0   :  { %682 = vst.msk [vmem:[%s2733_s5 + $0x30] sm:$0xff] %vm675_vm1, %v387_v43  ;;  %v402_v47 = vadd.f32 %v1497_v46, %v2081_v12  ;;  %v1601_v48 = vpop.f32.mrb[8].mxu1  ;;  %v396_v49 = vpop.f32.mrb[9].mxu0 }
  0xf1   :  { %1143 = vst.msk [vmem:[%s2734_s6 + $0x30] sm:$0xff] %vm1136_vm2, %v848_v45  ;;  %v863_v50 = vadd.f32 %v1601_v48, %v2086_v13  ;;  %v397_v51 = vadd.f32 %v2081_v12, %v396_v49  ;;  %v857_v52 = vpop.f32.mrb[9].mxu1 }
  0xf2   :  { %685 = vst.msk [vmem:[%s2733_s5 + $0x48] sm:$0xff] %vm675_vm1, %v402_v47  ;;  %v858_v53 = vadd.f32 %v2086_v13, %v857_v52 }
  0xf3   :  { %1146 = vst.msk [vmem:[%s2734_s6 + $0x48] sm:$0xff] %vm1136_vm2, %v863_v50  ;;  %v1500_v54 = vpop.f32.mrb[10].mxu0 }
  0xf4   :  { %684 = vst.msk [vmem:[%s2733_s5 + $0x40] sm:$0xff] %vm675_vm1, %v397_v51  ;;  %v412_v55 = vadd.f32 %v1500_v54, %v2081_v12  ;;  %v1604_v56 = vpop.f32.mrb[10].mxu1  ;;  %v406_v57 = vpop.f32.mrb[11].mxu0 }
  0xf5   :  { %1145 = vst.msk [vmem:[%s2734_s6 + $0x40] sm:$0xff] %vm1136_vm2, %v858_v53  ;;  %v873_v58 = vadd.f32 %v1604_v56, %v2086_v13  ;;  %v407_v59 = vadd.f32 %v2081_v12, %v406_v57  ;;  %v867_v60 = vpop.f32.mrb[11].mxu1 }
  0xf6   :  { %687 = vst.msk [vmem:[%s2733_s5 + $0x58] sm:$0xff] %vm675_vm1, %v412_v55  ;;  %v868_v61 = vadd.f32 %v2086_v13, %v867_v60 }
  0xf7   :  { %1148 = vst.msk [vmem:[%s2734_s6 + $0x58] sm:$0xff] %vm1136_vm2, %v873_v58  ;;  %v1503_v62 = vpop.f32.mrb[12].mxu0 }
  0xf8   :  { %686 = vst.msk [vmem:[%s2733_s5 + $0x50] sm:$0xff] %vm675_vm1, %v407_v59  ;;  %v422_v63 = vadd.f32 %v1503_v62, %v2081_v12  ;;  %v1607_v0 = vpop.f32.mrb[12].mxu1  ;;  %v416_v1 = vpop.f32.mrb[13].mxu0 }
  0xf9   :  { %1147 = vst.msk [vmem:[%s2734_s6 + $0x50] sm:$0xff] %vm1136_vm2, %v868_v61  ;;  %v883_v2 = vadd.f32 %v1607_v0, %v2086_v13  ;;  %v417_v3 = vadd.f32 %v2081_v12, %v416_v1  ;;  %v877_v4 = vpop.f32.mrb[13].mxu1 }
  0xfa   :  { %689 = vst.msk [vmem:[%s2733_s5 + $0x68] sm:$0xff] %vm675_vm1, %v422_v63  ;;  %v878_v5 = vadd.f32 %v2086_v13, %v877_v4 }
  0xfb   :  { %1150 = vst.msk [vmem:[%s2734_s6 + $0x68] sm:$0xff] %vm1136_vm2, %v883_v2  ;;  %v1506_v6 = vpop.f32.mrb[14].mxu0 }
  0xfc   :  { %688 = vst.msk [vmem:[%s2733_s5 + $0x60] sm:$0xff] %vm675_vm1, %v417_v3  ;;  %v432_v7 = vadd.f32 %v1506_v6, %v2081_v12  ;;  %v1610_v8 = vpop.f32.mrb[14].mxu1  ;;  %v426_v9 = vpop.f32.mrb[15].mxu0 }
  0xfd   :  { %1149 = vst.msk [vmem:[%s2734_s6 + $0x60] sm:$0xff] %vm1136_vm2, %v878_v5  ;;  %v893_v10 = vadd.f32 %v1610_v8, %v2086_v13  ;;  %v427_v11 = vadd.f32 %v2081_v12, %v426_v9  ;;  %v887_v14 = vpop.f32.mrb[15].mxu1 }
  0xfe   :  { %691 = vst.msk [vmem:[%s2733_s5 + $0x78] sm:$0xff] %vm675_vm1, %v432_v7  ;;  %v888_v15 = vadd.f32 %v2086_v13, %v887_v14 }
  0xff   :  { %1152 = vst.msk [vmem:[%s2734_s6 + $0x78] sm:$0xff] %vm1136_vm2, %v893_v10  ;;  %v1509_v16 = vpop.f32.mrb[16].mxu0 }
 0x100   :  { %690 = vst.msk [vmem:[%s2733_s5 + $0x70] sm:$0xff] %vm675_vm1, %v427_v11  ;;  %v442_v17 = vadd.f32 %v1509_v16, %v2081_v12  ;;  %v1613_v18 = vpop.f32.mrb[16].mxu1  ;;  %v436_v19 = vpop.f32.mrb[17].mxu0 }
 0x101   :  { %1151 = vst.msk [vmem:[%s2734_s6 + $0x70] sm:$0xff] %vm1136_vm2, %v888_v15  ;;  %v903_v20 = vadd.f32 %v1613_v18, %v2086_v13  ;;  %v437_v21 = vadd.f32 %v2081_v12, %v436_v19  ;;  %v897_v22 = vpop.f32.mrb[17].mxu1 }
 0x102   :  { %693 = vst.msk [vmem:[%s2733_s5 + $0x88] sm:$0xff] %vm675_vm1, %v442_v17  ;;  %v898_v23 = vadd.f32 %v2086_v13, %v897_v22 }
 0x103   :  { %1154 = vst.msk [vmem:[%s2734_s6 + $0x88] sm:$0xff] %vm1136_vm2, %v903_v20  ;;  %v1512_v24 = vpop.f32.mrb[18].mxu0 }
 0x104   :  { %692 = vst.msk [vmem:[%s2733_s5 + $0x80] sm:$0xff] %vm675_vm1, %v437_v21  ;;  %v452_v25 = vadd.f32 %v1512_v24, %v2081_v12  ;;  %v1616_v26 = vpop.f32.mrb[18].mxu1  ;;  %v446_v27 = vpop.f32.mrb[19].mxu0 }
 0x105   :  { %1153 = vst.msk [vmem:[%s2734_s6 + $0x80] sm:$0xff] %vm1136_vm2, %v898_v23  ;;  %v913_v28 = vadd.f32 %v1616_v26, %v2086_v13  ;;  %v447_v29 = vadd.f32 %v2081_v12, %v446_v27  ;;  %v907_v30 = vpop.f32.mrb[19].mxu1 }
 0x106   :  { %695 = vst.msk [vmem:[%s2733_s5 + $0x98] sm:$0xff] %vm675_vm1, %v452_v25  ;;  %v908_v31 = vadd.f32 %v2086_v13, %v907_v30 }
 0x107   :  { %1156 = vst.msk [vmem:[%s2734_s6 + $0x98] sm:$0xff] %vm1136_vm2, %v913_v28  ;;  %v1515_v32 = vpop.f32.mrb[20].mxu0 }
 0x108   :  { %694 = vst.msk [vmem:[%s2733_s5 + $0x90] sm:$0xff] %vm675_vm1, %v447_v29  ;;  %v462_v33 = vadd.f32 %v1515_v32, %v2081_v12  ;;  %v1619_v34 = vpop.f32.mrb[20].mxu1  ;;  %v456_v35 = vpop.f32.mrb[21].mxu0 }
 0x109   :  { %1155 = vst.msk [vmem:[%s2734_s6 + $0x90] sm:$0xff] %vm1136_vm2, %v908_v31  ;;  %v923_v36 = vadd.f32 %v1619_v34, %v2086_v13  ;;  %v457_v37 = vadd.f32 %v2081_v12, %v456_v35  ;;  %v917_v38 = vpop.f32.mrb[21].mxu1 }
 0x10a   :  { %697 = vst.msk [vmem:[%s2733_s5 + $0xa8] sm:$0xff] %vm675_vm1, %v462_v33  ;;  %v918_v39 = vadd.f32 %v2086_v13, %v917_v38 }
 0x10b   :  { %1158 = vst.msk [vmem:[%s2734_s6 + $0xa8] sm:$0xff] %vm1136_vm2, %v923_v36  ;;  %v1518_v40 = vpop.f32.mrb[22].mxu0 }
 0x10c   :  { %696 = vst.msk [vmem:[%s2733_s5 + $0xa0] sm:$0xff] %vm675_vm1, %v457_v37  ;;  %v472_v41 = vadd.f32 %v1518_v40, %v2081_v12  ;;  %v1622_v42 = vpop.f32.mrb[22].mxu1  ;;  %v466_v43 = vpop.f32.mrb[23].mxu0 }
 0x10d   :  { %1157 = vst.msk [vmem:[%s2734_s6 + $0xa0] sm:$0xff] %vm1136_vm2, %v918_v39  ;;  %v933_v44 = vadd.f32 %v1622_v42, %v2086_v13  ;;  %v467_v45 = vadd.f32 %v2081_v12, %v466_v43  ;;  %v927_v46 = vpop.f32.mrb[23].mxu1 }
 0x10e   :  { %699 = vst.msk [vmem:[%s2733_s5 + $0xb8] sm:$0xff] %vm675_vm1, %v472_v41  ;;  %v928_v47 = vadd.f32 %v2086_v13, %v927_v46 }
 0x10f   :  { %1160 = vst.msk [vmem:[%s2734_s6 + $0xb8] sm:$0xff] %vm1136_vm2, %v933_v44  ;;  %v1521_v48 = vpop.f32.mrb[24].mxu0 }
 0x110   :  { %698 = vst.msk [vmem:[%s2733_s5 + $0xb0] sm:$0xff] %vm675_vm1, %v467_v45  ;;  %v482_v49 = vadd.f32 %v1521_v48, %v2081_v12  ;;  %v1625_v50 = vpop.f32.mrb[24].mxu1  ;;  %v476_v51 = vpop.f32.mrb[25].mxu0 }
 0x111   :  { %1159 = vst.msk [vmem:[%s2734_s6 + $0xb0] sm:$0xff] %vm1136_vm2, %v928_v47  ;;  %v943_v52 = vadd.f32 %v1625_v50, %v2086_v13  ;;  %v477_v53 = vadd.f32 %v2081_v12, %v476_v51  ;;  %v937_v54 = vpop.f32.mrb[25].mxu1 }
 0x112   :  { %701 = vst.msk [vmem:[%s2733_s5 + $0xc8] sm:$0xff] %vm675_vm1, %v482_v49  ;;  %v938_v55 = vadd.f32 %v2086_v13, %v937_v54 }
 0x113   :  { %1162 = vst.msk [vmem:[%s2734_s6 + $0xc8] sm:$0xff] %vm1136_vm2, %v943_v52  ;;  %v1524_v56 = vpop.f32.mrb[26].mxu0 }
 0x114   :  { %700 = vst.msk [vmem:[%s2733_s5 + $0xc0] sm:$0xff] %vm675_vm1, %v477_v53  ;;  %v492_v57 = vadd.f32 %v1524_v56, %v2081_v12  ;;  %v1628_v58 = vpop.f32.mrb[26].mxu1  ;;  %v486_v59 = vpop.f32.mrb[27].mxu0 }
 0x115   :  { %1161 = vst.msk [vmem:[%s2734_s6 + $0xc0] sm:$0xff] %vm1136_vm2, %v938_v55  ;;  %v953_v60 = vadd.f32 %v1628_v58, %v2086_v13  ;;  %v487_v61 = vadd.f32 %v2081_v12, %v486_v59  ;;  %v947_v62 = vpop.f32.mrb[27].mxu1 }
 0x116   :  { %703 = vst.msk [vmem:[%s2733_s5 + $0xd8] sm:$0xff] %vm675_vm1, %v492_v57  ;;  %v948_v63 = vadd.f32 %v2086_v13, %v947_v62 }
 0x117   :  { %1164 = vst.msk [vmem:[%s2734_s6 + $0xd8] sm:$0xff] %vm1136_vm2, %v953_v60  ;;  %v1527_v0 = vpop.f32.mrb[28].mxu0 }
 0x118   :  { %702 = vst.msk [vmem:[%s2733_s5 + $0xd0] sm:$0xff] %vm675_vm1, %v487_v61  ;;  %v502_v1 = vadd.f32 %v1527_v0, %v2081_v12  ;;  %v1631_v2 = vpop.f32.mrb[28].mxu1  ;;  %v496_v3 = vpop.f32.mrb[29].mxu0 }
 0x119   :  { %1163 = vst.msk [vmem:[%s2734_s6 + $0xd0] sm:$0xff] %vm1136_vm2, %v948_v63  ;;  %v963_v4 = vadd.f32 %v1631_v2, %v2086_v13  ;;  %v497_v5 = vadd.f32 %v2081_v12, %v496_v3  ;;  %v957_v6 = vpop.f32.mrb[29].mxu1 }
 0x11a   :  { %705 = vst.msk [vmem:[%s2733_s5 + $0xe8] sm:$0xff] %vm675_vm1, %v502_v1  ;;  %v958_v7 = vadd.f32 %v2086_v13, %v957_v6 }
 0x11b   :  { %1166 = vst.msk [vmem:[%s2734_s6 + $0xe8] sm:$0xff] %vm1136_vm2, %v963_v4  ;;  %v1530_v8 = vpop.f32.mrb[30].mxu0 }
 0x11c   :  { %704 = vst.msk [vmem:[%s2733_s5 + $0xe0] sm:$0xff] %vm675_vm1, %v497_v5  ;;  %v512_v9 = vadd.f32 %v1530_v8, %v2081_v12  ;;  %v1634_v10 = vpop.f32.mrb[30].mxu1  ;;  %v506_v11 = vpop.f32.mrb[31].mxu0 }
 0x11d   :  { %1165 = vst.msk [vmem:[%s2734_s6 + $0xe0] sm:$0xff] %vm1136_vm2, %v958_v7  ;;  %v973_v14 = vadd.f32 %v1634_v10, %v2086_v13  ;;  %v507_v15 = vadd.f32 %v2081_v12, %v506_v11  ;;  %v967_v16 = vpop.f32.mrb[31].mxu1 }
 0x11e   :  { %707 = vst.msk [vmem:[%s2733_s5 + $0xf8] sm:$0xff] %vm675_vm1, %v512_v9  ;;  %v968_v17 = vadd.f32 %v2086_v13, %v967_v16 }
 0x11f   :  { %1168 = vst.msk [vmem:[%s2734_s6 + $0xf8] sm:$0xff] %vm1136_vm2, %v973_v14  ;;  %v1533_v18 = vpop.f32.mrb[32].mxu0 }
 0x120   :  { %706 = vst.msk [vmem:[%s2733_s5 + $0xf0] sm:$0xff] %vm675_vm1, %v507_v15  ;;  %v522_v19 = vadd.f32 %v1533_v18, %v2081_v12  ;;  %v1637_v20 = vpop.f32.mrb[32].mxu1  ;;  %v516_v21 = vpop.f32.mrb[33].mxu0 }
 0x121   :  { %1167 = vst.msk [vmem:[%s2734_s6 + $0xf0] sm:$0xff] %vm1136_vm2, %v968_v17  ;;  %v983_v22 = vadd.f32 %v1637_v20, %v2086_v13  ;;  %v517_v23 = vadd.f32 %v2081_v12, %v516_v21  ;;  %v977_v24 = vpop.f32.mrb[33].mxu1 }
 0x122   :  { %709 = vst.msk [vmem:[%s2733_s5 + $0x108] sm:$0xff] %vm675_vm1, %v522_v19  ;;  %v978_v25 = vadd.f32 %v2086_v13, %v977_v24 }
 0x123   :  { %1170 = vst.msk [vmem:[%s2734_s6 + $0x108] sm:$0xff] %vm1136_vm2, %v983_v22  ;;  %v1536_v26 = vpop.f32.mrb[34].mxu0 }
 0x124   :  { %708 = vst.msk [vmem:[%s2733_s5 + $0x100] sm:$0xff] %vm675_vm1, %v517_v23  ;;  %v532_v27 = vadd.f32 %v1536_v26, %v2081_v12  ;;  %v1640_v28 = vpop.f32.mrb[34].mxu1  ;;  %v526_v29 = vpop.f32.mrb[35].mxu0 }
 0x125   :  { %1169 = vst.msk [vmem:[%s2734_s6 + $0x100] sm:$0xff] %vm1136_vm2, %v978_v25  ;;  %v993_v30 = vadd.f32 %v1640_v28, %v2086_v13  ;;  %v527_v31 = vadd.f32 %v2081_v12, %v526_v29  ;;  %v987_v32 = vpop.f32.mrb[35].mxu1 }
 0x126   :  { %711 = vst.msk [vmem:[%s2733_s5 + $0x118] sm:$0xff] %vm675_vm1, %v532_v27  ;;  %v988_v33 = vadd.f32 %v2086_v13, %v987_v32 }
 0x127   :  { %1172 = vst.msk [vmem:[%s2734_s6 + $0x118] sm:$0xff] %vm1136_vm2, %v993_v30  ;;  %v1539_v34 = vpop.f32.mrb[36].mxu0 }
 0x128   :  { %710 = vst.msk [vmem:[%s2733_s5 + $0x110] sm:$0xff] %vm675_vm1, %v527_v31  ;;  %v542_v35 = vadd.f32 %v1539_v34, %v2081_v12  ;;  %v1643_v36 = vpop.f32.mrb[36].mxu1  ;;  %v536_v37 = vpop.f32.mrb[37].mxu0 }
 0x129   :  { %1171 = vst.msk [vmem:[%s2734_s6 + $0x110] sm:$0xff] %vm1136_vm2, %v988_v33  ;;  %v1003_v38 = vadd.f32 %v1643_v36, %v2086_v13  ;;  %v537_v39 = vadd.f32 %v2081_v12, %v536_v37  ;;  %v997_v40 = vpop.f32.mrb[37].mxu1 }
 0x12a   :  { %713 = vst.msk [vmem:[%s2733_s5 + $0x128] sm:$0xff] %vm675_vm1, %v542_v35  ;;  %v998_v41 = vadd.f32 %v2086_v13, %v997_v40 }
 0x12b   :  { %1174 = vst.msk [vmem:[%s2734_s6 + $0x128] sm:$0xff] %vm1136_vm2, %v1003_v38  ;;  %v1542_v42 = vpop.f32.mrb[38].mxu0 }
 0x12c   :  { %712 = vst.msk [vmem:[%s2733_s5 + $0x120] sm:$0xff] %vm675_vm1, %v537_v39  ;;  %v552_v43 = vadd.f32 %v1542_v42, %v2081_v12  ;;  %v1646_v44 = vpop.f32.mrb[38].mxu1  ;;  %v546_v45 = vpop.f32.mrb[39].mxu0 }
 0x12d   :  { %1173 = vst.msk [vmem:[%s2734_s6 + $0x120] sm:$0xff] %vm1136_vm2, %v998_v41  ;;  %v1013_v46 = vadd.f32 %v1646_v44, %v2086_v13  ;;  %v547_v47 = vadd.f32 %v2081_v12, %v546_v45  ;;  %v1007_v48 = vpop.f32.mrb[39].mxu1 }
 0x12e   :  { %715 = vst.msk [vmem:[%s2733_s5 + $0x138] sm:$0xff] %vm675_vm1, %v552_v43  ;;  %v1008_v49 = vadd.f32 %v2086_v13, %v1007_v48 }
 0x12f   :  { %1176 = vst.msk [vmem:[%s2734_s6 + $0x138] sm:$0xff] %vm1136_vm2, %v1013_v46  ;;  %v1545_v50 = vpop.f32.mrb[40].mxu0 }
 0x130   :  { %714 = vst.msk [vmem:[%s2733_s5 + $0x130] sm:$0xff] %vm675_vm1, %v547_v47  ;;  %v562_v51 = vadd.f32 %v1545_v50, %v2081_v12  ;;  %v1649_v52 = vpop.f32.mrb[40].mxu1  ;;  %v556_v53 = vpop.f32.mrb[41].mxu0 }
 0x131   :  { %1175 = vst.msk [vmem:[%s2734_s6 + $0x130] sm:$0xff] %vm1136_vm2, %v1008_v49  ;;  %v1023_v54 = vadd.f32 %v1649_v52, %v2086_v13  ;;  %v557_v55 = vadd.f32 %v2081_v12, %v556_v53  ;;  %v1017_v56 = vpop.f32.mrb[41].mxu1 }
 0x132   :  { %717 = vst.msk [vmem:[%s2733_s5 + $0x148] sm:$0xff] %vm675_vm1, %v562_v51  ;;  %v1018_v57 = vadd.f32 %v2086_v13, %v1017_v56 }
 0x133   :  { %1178 = vst.msk [vmem:[%s2734_s6 + $0x148] sm:$0xff] %vm1136_vm2, %v1023_v54  ;;  %v1548_v58 = vpop.f32.mrb[42].mxu0 }
 0x134   :  { %716 = vst.msk [vmem:[%s2733_s5 + $0x140] sm:$0xff] %vm675_vm1, %v557_v55  ;;  %v572_v59 = vadd.f32 %v1548_v58, %v2081_v12  ;;  %v1652_v60 = vpop.f32.mrb[42].mxu1  ;;  %v566_v61 = vpop.f32.mrb[43].mxu0 }
 0x135   :  { %1177 = vst.msk [vmem:[%s2734_s6 + $0x140] sm:$0xff] %vm1136_vm2, %v1018_v57  ;;  %v1033_v62 = vadd.f32 %v1652_v60, %v2086_v13  ;;  %v567_v63 = vadd.f32 %v2081_v12, %v566_v61  ;;  %v1027_v0 = vpop.f32.mrb[43].mxu1 }
 0x136   :  { %719 = vst.msk [vmem:[%s2733_s5 + $0x158] sm:$0xff] %vm675_vm1, %v572_v59  ;;  %v1028_v1 = vadd.f32 %v2086_v13, %v1027_v0 }
 0x137   :  { %1180 = vst.msk [vmem:[%s2734_s6 + $0x158] sm:$0xff] %vm1136_vm2, %v1033_v62  ;;  %v1551_v2 = vpop.f32.mrb[44].mxu0 }
 0x138   :  { %718 = vst.msk [vmem:[%s2733_s5 + $0x150] sm:$0xff] %vm675_vm1, %v567_v63  ;;  %v582_v3 = vadd.f32 %v1551_v2, %v2081_v12  ;;  %v1655_v4 = vpop.f32.mrb[44].mxu1  ;;  %v576_v5 = vpop.f32.mrb[45].mxu0 }
 0x139   :  { %1179 = vst.msk [vmem:[%s2734_s6 + $0x150] sm:$0xff] %vm1136_vm2, %v1028_v1  ;;  %v1043_v6 = vadd.f32 %v1655_v4, %v2086_v13  ;;  %v577_v7 = vadd.f32 %v2081_v12, %v576_v5  ;;  %v1037_v8 = vpop.f32.mrb[45].mxu1 }
 0x13a   :  { %721 = vst.msk [vmem:[%s2733_s5 + $0x168] sm:$0xff] %vm675_vm1, %v582_v3  ;;  %v1038_v9 = vadd.f32 %v2086_v13, %v1037_v8 }
 0x13b   :  { %1182 = vst.msk [vmem:[%s2734_s6 + $0x168] sm:$0xff] %vm1136_vm2, %v1043_v6  ;;  %v1554_v10 = vpop.f32.mrb[46].mxu0 }
 0x13c   :  { %720 = vst.msk [vmem:[%s2733_s5 + $0x160] sm:$0xff] %vm675_vm1, %v577_v7  ;;  %v592_v11 = vadd.f32 %v1554_v10, %v2081_v12  ;;  %v1658_v14 = vpop.f32.mrb[46].mxu1  ;;  %v586_v15 = vpop.f32.mrb[47].mxu0 }
 0x13d   :  { %1181 = vst.msk [vmem:[%s2734_s6 + $0x160] sm:$0xff] %vm1136_vm2, %v1038_v9  ;;  %v1053_v16 = vadd.f32 %v1658_v14, %v2086_v13  ;;  %v587_v17 = vadd.f32 %v2081_v12, %v586_v15  ;;  %v1047_v18 = vpop.f32.mrb[47].mxu1 }
 0x13e   :  { %723 = vst.msk [vmem:[%s2733_s5 + $0x178] sm:$0xff] %vm675_vm1, %v592_v11  ;;  %v1048_v19 = vadd.f32 %v2086_v13, %v1047_v18 }
 0x13f   :  { %1184 = vst.msk [vmem:[%s2734_s6 + $0x178] sm:$0xff] %vm1136_vm2, %v1053_v16  ;;  %v1557_v20 = vpop.f32.mrb[48].mxu0 }
 0x140   :  { %722 = vst.msk [vmem:[%s2733_s5 + $0x170] sm:$0xff] %vm675_vm1, %v587_v17  ;;  %v602_v21 = vadd.f32 %v1557_v20, %v2081_v12  ;;  %v1661_v22 = vpop.f32.mrb[48].mxu1  ;;  %v596_v23 = vpop.f32.mrb[49].mxu0 }
 0x141   :  { %1183 = vst.msk [vmem:[%s2734_s6 + $0x170] sm:$0xff] %vm1136_vm2, %v1048_v19  ;;  %v1063_v24 = vadd.f32 %v1661_v22, %v2086_v13  ;;  %v597_v25 = vadd.f32 %v2081_v12, %v596_v23  ;;  %v1057_v26 = vpop.f32.mrb[49].mxu1 }
 0x142   :  { %725 = vst.msk [vmem:[%s2733_s5 + $0x188] sm:$0xff] %vm675_vm1, %v602_v21  ;;  %v1058_v27 = vadd.f32 %v2086_v13, %v1057_v26 }
 0x143   :  { %1186 = vst.msk [vmem:[%s2734_s6 + $0x188] sm:$0xff] %vm1136_vm2, %v1063_v24  ;;  %v1560_v28 = vpop.f32.mrb[50].mxu0 }
 0x144   :  { %724 = vst.msk [vmem:[%s2733_s5 + $0x180] sm:$0xff] %vm675_vm1, %v597_v25  ;;  %v612_v29 = vadd.f32 %v1560_v28, %v2081_v12  ;;  %v1664_v30 = vpop.f32.mrb[50].mxu1  ;;  %v606_v31 = vpop.f32.mrb[51].mxu0 }
 0x145   :  { %1185 = vst.msk [vmem:[%s2734_s6 + $0x180] sm:$0xff] %vm1136_vm2, %v1058_v27  ;;  %v1073_v32 = vadd.f32 %v1664_v30, %v2086_v13  ;;  %v607_v33 = vadd.f32 %v2081_v12, %v606_v31  ;;  %v1067_v34 = vpop.f32.mrb[51].mxu1 }
 0x146   :  { %727 = vst.msk [vmem:[%s2733_s5 + $0x198] sm:$0xff] %vm675_vm1, %v612_v29  ;;  %v1068_v35 = vadd.f32 %v2086_v13, %v1067_v34 }
 0x147   :  { %1188 = vst.msk [vmem:[%s2734_s6 + $0x198] sm:$0xff] %vm1136_vm2, %v1073_v32  ;;  %v1563_v36 = vpop.f32.mrb[52].mxu0 }
 0x148   :  { %726 = vst.msk [vmem:[%s2733_s5 + $0x190] sm:$0xff] %vm675_vm1, %v607_v33  ;;  %v622_v37 = vadd.f32 %v1563_v36, %v2081_v12  ;;  %v1667_v38 = vpop.f32.mrb[52].mxu1  ;;  %v616_v39 = vpop.f32.mrb[53].mxu0 }
 0x149   :  { %1187 = vst.msk [vmem:[%s2734_s6 + $0x190] sm:$0xff] %vm1136_vm2, %v1068_v35  ;;  %v1083_v40 = vadd.f32 %v1667_v38, %v2086_v13  ;;  %v617_v41 = vadd.f32 %v2081_v12, %v616_v39  ;;  %v1077_v42 = vpop.f32.mrb[53].mxu1 }
 0x14a   :  { %729 = vst.msk [vmem:[%s2733_s5 + $0x1a8] sm:$0xff] %vm675_vm1, %v622_v37  ;;  %v1078_v43 = vadd.f32 %v2086_v13, %v1077_v42 }
 0x14b   :  { %1190 = vst.msk [vmem:[%s2734_s6 + $0x1a8] sm:$0xff] %vm1136_vm2, %v1083_v40  ;;  %v1566_v44 = vpop.f32.mrb[54].mxu0 }
 0x14c   :  { %728 = vst.msk [vmem:[%s2733_s5 + $0x1a0] sm:$0xff] %vm675_vm1, %v617_v41  ;;  %v632_v45 = vadd.f32 %v1566_v44, %v2081_v12  ;;  %v1670_v46 = vpop.f32.mrb[54].mxu1  ;;  %v626_v47 = vpop.f32.mrb[55].mxu0 }
 0x14d   :  { %1189 = vst.msk [vmem:[%s2734_s6 + $0x1a0] sm:$0xff] %vm1136_vm2, %v1078_v43  ;;  %v1093_v48 = vadd.f32 %v1670_v46, %v2086_v13  ;;  %v627_v49 = vadd.f32 %v2081_v12, %v626_v47  ;;  %v1087_v50 = vpop.f32.mrb[55].mxu1 }
 0x14e   :  { %731 = vst.msk [vmem:[%s2733_s5 + $0x1b8] sm:$0xff] %vm675_vm1, %v632_v45  ;;  %v1088_v51 = vadd.f32 %v2086_v13, %v1087_v50 }
 0x14f   :  { %1192 = vst.msk [vmem:[%s2734_s6 + $0x1b8] sm:$0xff] %vm1136_vm2, %v1093_v48  ;;  %v1569_v52 = vpop.f32.mrb[56].mxu0 }
 0x150   :  { %730 = vst.msk [vmem:[%s2733_s5 + $0x1b0] sm:$0xff] %vm675_vm1, %v627_v49  ;;  %v642_v53 = vadd.f32 %v1569_v52, %v2081_v12  ;;  %v1673_v54 = vpop.f32.mrb[56].mxu1  ;;  %v636_v55 = vpop.f32.mrb[57].mxu0 }
 0x151   :  { %1191 = vst.msk [vmem:[%s2734_s6 + $0x1b0] sm:$0xff] %vm1136_vm2, %v1088_v51  ;;  %v1103_v56 = vadd.f32 %v1673_v54, %v2086_v13  ;;  %v637_v57 = vadd.f32 %v2081_v12, %v636_v55  ;;  %v1097_v58 = vpop.f32.mrb[57].mxu1 }
 0x152   :  { %733 = vst.msk [vmem:[%s2733_s5 + $0x1c8] sm:$0xff] %vm675_vm1, %v642_v53  ;;  %v1098_v59 = vadd.f32 %v2086_v13, %v1097_v58 }
 0x153   :  { %1194 = vst.msk [vmem:[%s2734_s6 + $0x1c8] sm:$0xff] %vm1136_vm2, %v1103_v56  ;;  %v1572_v60 = vpop.f32.mrb[58].mxu0 }
 0x154   :  { %732 = vst.msk [vmem:[%s2733_s5 + $0x1c0] sm:$0xff] %vm675_vm1, %v637_v57  ;;  %v652_v61 = vadd.f32 %v1572_v60, %v2081_v12  ;;  %v1676_v62 = vpop.f32.mrb[58].mxu1  ;;  %v646_v63 = vpop.f32.mrb[59].mxu0 }
 0x155   :  { %1193 = vst.msk [vmem:[%s2734_s6 + $0x1c0] sm:$0xff] %vm1136_vm2, %v1098_v59  ;;  %v1113_v0 = vadd.f32 %v1676_v62, %v2086_v13  ;;  %v647_v1 = vadd.f32 %v2081_v12, %v646_v63  ;;  %v1107_v2 = vpop.f32.mrb[59].mxu1 }
 0x156   :  { %735 = vst.msk [vmem:[%s2733_s5 + $0x1d8] sm:$0xff] %vm675_vm1, %v652_v61  ;;  %v1108_v3 = vadd.f32 %v2086_v13, %v1107_v2 }
 0x157   :  { %1196 = vst.msk [vmem:[%s2734_s6 + $0x1d8] sm:$0xff] %vm1136_vm2, %v1113_v0  ;;  %v1575_v4 = vpop.f32.mrb[60].mxu0 }
 0x158   :  { %734 = vst.msk [vmem:[%s2733_s5 + $0x1d0] sm:$0xff] %vm675_vm1, %v647_v1  ;;  %v662_v5 = vadd.f32 %v1575_v4, %v2081_v12  ;;  %v1679_v6 = vpop.f32.mrb[60].mxu1  ;;  %v656_v7 = vpop.f32.mrb[61].mxu0 }
 0x159   :  { %1195 = vst.msk [vmem:[%s2734_s6 + $0x1d0] sm:$0xff] %vm1136_vm2, %v1108_v3  ;;  %v1123_v8 = vadd.f32 %v1679_v6, %v2086_v13  ;;  %v657_v9 = vadd.f32 %v2081_v12, %v656_v7  ;;  %v1117_v10 = vpop.f32.mrb[61].mxu1 }
 0x15a   :  { %737 = vst.msk [vmem:[%s2733_s5 + $0x1e8] sm:$0xff] %vm675_vm1, %v662_v5  ;;  %v1118_v11 = vadd.f32 %v2086_v13, %v1117_v10 }
 0x15b   :  { %1198 = vst.msk [vmem:[%s2734_s6 + $0x1e8] sm:$0xff] %vm1136_vm2, %v1123_v8  ;;  %v1578_v14 = vpop.f32.mrb[62].mxu0 }
 0x15c   :  { %736 = vst.msk [vmem:[%s2733_s5 + $0x1e0] sm:$0xff] %vm675_vm1, %v657_v9  ;;  %v672_v15 = vadd.f32 %v1578_v14, %v2081_v12  ;;  %v1682_v16 = vpop.f32.mrb[62].mxu1  ;;  %v666_v17 = vpop.f32.mrb[63].mxu0 }
 0x15d   :  { %1197 = vst.msk [vmem:[%s2734_s6 + $0x1e0] sm:$0xff] %vm1136_vm2, %v1118_v11  ;;  %v1133_v18 = vadd.f32 %v1682_v16, %v2086_v13  ;;  %v667_v19 = vadd.f32 %v2081_v12, %v666_v17  ;;  %v1127_v20 = vpop.f32.mrb[63].mxu1 }
 0x15e   :  { %739 = vst.msk [vmem:[%s2733_s5 + $0x1f8] sm:$0xff] %vm675_vm1, %v672_v15  ;;  %v1128_v21 = vadd.f32 %v2086_v13, %v1127_v20 }
 0x15f   :  { %1200 = vst.msk [vmem:[%s2734_s6 + $0x1f8] sm:$0xff] %vm1136_vm2, %v1133_v18 }
 0x160   :  { %738 = vst.msk [vmem:[%s2733_s5 + $0x1f0] sm:$0xff] %vm675_vm1, %v667_v19 }
 0x161   :  { %1199 = vst.msk [vmem:[%s2734_s6 + $0x1f0] sm:$0xff] %vm1136_vm2, %v1128_v21 }

</bundles_post_ra>
